<compile_context>
chip_gen: v6e
topology: v6e:2x2x1
jax: 0.10.0
libtpu: 0.0.40
codegen_flags: <defaults>
</compile_context>

<pallas_src>
import math
import functools

import jax
import jax.numpy as jnp
from jax.experimental import pallas as pl
from jax.experimental.pallas import tpu as pltpu

RMS_EPS = 1e-6     # RMSNorm eps (spec)
LN_EPS = 1e-5      # torch.nn.LayerNorm default eps
NEG_BIG = 1e9


def _dot(a, b):
    """[M, K] @ [K, N] with bf16 operands, f32 accumulation (MXU)."""
    return jnp.dot(a.astype(jnp.bfloat16), b.astype(jnp.bfloat16),
                   preferred_element_type=jnp.float32)


def _cost(flops, transcendentals, bytes_accessed):
    return pl.CostEstimate(flops=int(flops), transcendentals=int(transcendentals),
                           bytes_accessed=int(bytes_accessed))


# --------------------- K1: fused RMSNorm1 + QKV projection -------------------
def _rmsnorm_qkv_kernel(x_ref, lnw_ref, wqkv_ref, qkv_ref):
    x = x_ref[...]                                        # [T, H] f32
    var = jnp.mean(x * x, axis=-1, keepdims=True)
    xn = x * jax.lax.rsqrt(var + RMS_EPS) * lnw_ref[...]
    qkv_ref[...] = _dot(xn, wqkv_ref[...])                # [T, 3H] f32


# ---- K2: attention + o_proj + residual + RMSNorm2 + MLP + residual ----------
def _attn_mlp_kernel(x_ref, q_ref, k_ref, v_ref, mask_ref, wo_ref, ln2_ref,
                     wup_ref, wdn_ref, out_ref, *, n_heads, head_dim, scale):
    bf16 = jnp.bfloat16
    x = x_ref[...]                                        # [S, H] residual, f32
    qh = q_ref[...].astype(bf16)                          # [nh, S, hd]
    kh = k_ref[...].astype(bf16)
    vh = v_ref[...].astype(bf16)

    # Single full-head-dim contraction per head, batched over heads.
    scores = jnp.einsum('hqd,hkd->hqk', qh, kh,
                        preferred_element_type=jnp.float32) * scale   # [nh,S,S]
    # key-padding mask (mask==0 -> -1e9); mask_ref is [1, S].
    bias = (mask_ref[...] - 1.0) * NEG_BIG
    scores = scores + bias[None, :, :]

    # f32 softmax; divide via approximate reciprocal on the EUP.
    m = jnp.max(scores, axis=-1, keepdims=True)
    p = jnp.exp(scores - m)
    probs = p * pl.reciprocal(jnp.sum(p, axis=-1, keepdims=True), approx=True)

    attn = jnp.einsum('hqk,hkd->hqd', probs.astype(bf16), vh,
                      preferred_element_type=jnp.float32)  # [nh, S, hd] f32

    # o_proj folded per head: concat_heads(attn) @ Wo == sum_h attn_h @ Wo_rows_h.
    # Leading-axis indexing + full-hd contraction; avoids an in-kernel transpose.
    acc = x
    for h in range(n_heads):
        acc = acc + _dot(attn[h], wo_ref[h * head_dim:(h + 1) * head_dim, :])

    # Fused post-attention RMSNorm (computed once) + MLP + residual.
    var = jnp.mean(acc * acc, axis=-1, keepdims=True)
    hn = acc * jax.lax.rsqrt(var + RMS_EPS) * ln2_ref[...]
    u = _dot(hn, wup_ref[...])                            # [S, F]
    # TODO(synk): U_MLP internals are not given in the spec; implemented as the
    # standard Linear -> GELU -> Linear block (dropout = identity in eval).
    a = jax.nn.gelu(u)
    out_ref[...] = acc + _dot(a, wdn_ref[...])


# --------------------- K3: final LayerNorm * mask ----------------------------
def _final_ln_kernel(x_ref, mask_ref, g_ref, b_ref, out_ref):
    x = x_ref[...]                                        # [T, H] f32
    mu = jnp.mean(x, axis=-1, keepdims=True)
    xc = x - mu
    var = jnp.mean(xc * xc, axis=-1, keepdims=True)
    y = xc * jax.lax.rsqrt(var + LN_EPS) * g_ref[...] + b_ref[...]
    out_ref[...] = y * mask_ref[...]                      # mask [T, 1]


# ------------------------------ pallas_call wrappers --------------------------
def rmsnorm_qkv(xf, lnw, wqkv):
    T, H = xf.shape
    H3 = wqkv.shape[1]
    return pl.pallas_call(
        _rmsnorm_qkv_kernel,
        out_shape=jax.ShapeDtypeStruct((T, H3), jnp.float32),
        grid=(1,),     # largest token tile (tm = T) — no forced multi-step grid
        in_specs=[pl.BlockSpec((T, H), lambda i: (0, 0)),
                  pl.BlockSpec((1, H), lambda i: (0, 0)),
                  pl.BlockSpec((H, H3), lambda i: (0, 0))],
        out_specs=pl.BlockSpec((T, H3), lambda i: (0, 0)),
        compiler_params=pltpu.CompilerParams(dimension_semantics=("arbitrary",)),
        cost_estimate=_cost(2 * T * H * H3, T,
                            4 * T * (H + H3) + 2 * H * H3 + 4 * H),
    )(xf, lnw, wqkv)


def attn_mlp_block(x, q, k, v, mask_b1s, lw, n_heads):
    B, S, H = x.shape
    hd = H // n_heads
    F = lw["wup"].shape[1]
    kern = functools.partial(_attn_mlp_kernel, n_heads=n_heads, head_dim=hd,
                             scale=1.0 / math.sqrt(hd))
    flops = B * (4 * n_heads * S * S * hd + 2 * S * H * H + 4 * S * H * F)
    trans = B * (n_heads * S * S + S * F)
    byts = 4 * B * S * (5 * H + 1) + 2 * (H * H + 2 * H * F) + 4 * H
    return pl.pallas_call(
        kern,
        out_shape=jax.ShapeDtypeStruct((B, S, H), jnp.float32),
        grid=(B,),
        in_specs=[
            pl.BlockSpec((None, S, H), lambda b: (b, 0, 0)),
            pl.BlockSpec((None, n_heads, S, hd), lambda b: (b, 0, 0, 0)),
            pl.BlockSpec((None, n_heads, S, hd), lambda b: (b, 0, 0, 0)),
            pl.BlockSpec((None, n_heads, S, hd), lambda b: (b, 0, 0, 0)),
            pl.BlockSpec((None, 1, S), lambda b: (b, 0, 0)),
            pl.BlockSpec((H, H), lambda b: (0, 0)),
            pl.BlockSpec((1, H), lambda b: (0, 0)),
            pl.BlockSpec((H, F), lambda b: (0, 0)),
            pl.BlockSpec((F, H), lambda b: (0, 0)),
        ],
        out_specs=pl.BlockSpec((None, S, H), lambda b: (b, 0, 0)),
        compiler_params=pltpu.CompilerParams(dimension_semantics=("parallel",)),
        cost_estimate=_cost(flops, trans, byts),
    )(x, q, k, v, mask_b1s, lw["wo"], lw["ln2"], lw["wup"], lw["wdn"])


def final_layernorm(xf, maskf, gamma, beta):
    T, H = xf.shape
    return pl.pallas_call(
        _final_ln_kernel,
        out_shape=jax.ShapeDtypeStruct((T, H), jnp.float32),
        grid=(1,),
        in_specs=[pl.BlockSpec((T, H), lambda i: (0, 0)),
                  pl.BlockSpec((T, 1), lambda i: (0, 0)),
                  pl.BlockSpec((1, H), lambda i: (0, 0)),
                  pl.BlockSpec((1, H), lambda i: (0, 0))],
        out_specs=pl.BlockSpec((T, H), lambda i: (0, 0)),
        compiler_params=pltpu.CompilerParams(dimension_semantics=("arbitrary",)),
        cost_estimate=_cost(8 * T * H, T, 8 * T * H + 8 * H + 4 * T),
    )(xf, maskf, gamma, beta)


# ------------------------------- model glue -----------------------------------
def transformer_layer(x, mask, lw, n_heads):
    B, S, H = x.shape
    hd = H // n_heads
    T = B * S
    qkv = rmsnorm_qkv(x.reshape(T, H), lw["ln1"], lw["wqkv"])       # [T, 3H]
    # Wrapper-side layout plumbing to head-major [B, nh, S, hd] blocks so the
    # attention kernel sees lane-dense per-head slabs (no in-kernel relayout).
    qkv = qkv.reshape(B, S, 3, n_heads, hd)
    q = jnp.transpose(qkv[:, :, 0], (0, 2, 1, 3))
    k = jnp.transpose(qkv[:, :, 1], (0, 2, 1, 3))
    v = jnp.transpose(qkv[:, :, 2], (0, 2, 1, 3))
    return attn_mlp_block(x, q, k, v, mask[:, None, :], lw, n_heads)


def model_forward(input_ids, w, n_heads, mask=None):
    B, S = input_ids.shape
    H = w["word_emb"].shape[1]
    if mask is None:
        mask = jnp.ones((B, S), jnp.float32)
    mask = mask.astype(jnp.float32)
    # Embeddings: word + position gather (XLA gather; tiny, not worth a Pallas
    # DMA-gather at these sizes).  TODO(synk): dropout layers are identity (eval).
    x = jnp.take(w["word_emb"], input_ids, axis=0) + w["pos_emb"][None, :S, :]
    for lw in w["layers"]:
        x = transformer_layer(x, mask, lw, n_heads)
    T = B * S
    out = final_layernorm(x.reshape(T, H), mask.reshape(T, 1),
                          w["final_g"], w["final_b"])
    return out.reshape(B, S, H)


def init_weights(key, vocab, max_len, H, F, n_layers):
    s = 0.02
    bf = jnp.bfloat16
    k_emb, k_pos, k_rest = jax.random.split(key, 3)
    w = {
        "word_emb": s * jax.random.normal(k_emb, (vocab, H), jnp.float32),
        "pos_emb": s * jax.random.normal(k_pos, (max_len, H), jnp.float32),
        "final_g": jnp.ones((1, H), jnp.float32),
        "final_b": jnp.zeros((1, H), jnp.float32),
        "layers": [],
    }
    lk = jax.random.split(k_rest, 6 * n_layers)
    for li in range(n_layers):
        kq, kk, kv, ko, ku, kd = (lk[6 * li + j] for j in range(6))
        wq = s * jax.random.normal(kq, (H, H), jnp.float32)
        wk = s * jax.random.normal(kk, (H, H), jnp.float32)
        wv = s * jax.random.normal(kv, (H, H), jnp.float32)
        w["layers"].append({
            "ln1": jnp.ones((1, H), jnp.float32),
            "ln2": jnp.ones((1, H), jnp.float32),
            # one-time packing: concat QKV; matmul weights cast to bf16 for MXU
            "wqkv": jnp.concatenate([wq, wk, wv], axis=1).astype(bf),
            "wo": (s * jax.random.normal(ko, (H, H), jnp.float32)).astype(bf),
            "wup": (s * jax.random.normal(ku, (H, F), jnp.float32)).astype(bf),
            "wdn": (s * jax.random.normal(kd, (F, H), jnp.float32)).astype(bf),
        })
    return w


if __name__ == "__main__":
    # Small demo config consistent with the module: batch=2, seq=8, hidden=32,
    # 4 heads (head_dim=8), MLP dim 64, vocab 64, 2 untied layers, no cls token.
    B, S, H = 2, 8, 32
    n_heads, F, vocab, max_len, n_layers = 4, 64, 64, 16, 2
    assert H % n_heads == 0

    key = jax.random.PRNGKey(0)
    k_ids, k_w = jax.random.split(key)
    input_ids = jax.random.randint(k_ids, (B, S), 0, vocab)
    weights = init_weights(k_w, vocab, max_len, H, F, n_layers)

    fwd = jax.jit(functools.partial(model_forward, n_heads=n_heads))
    out = fwd(input_ids, weights)
    out = jax.block_until_ready(out)

    assert out.shape == (B, S, H)
    assert bool(jnp.all(jnp.isfinite(out)))
    print("KERNEL_OK")
</pallas_src>

<mosaic_0001>
module attributes {stable_mosaic.version = 11 : i64} {
  func.func @_rmsnorm_qkv_kernel(%arg0: i32, %arg1: memref<16x32xf32, #tpu.memory_space<vmem>>, %arg2: memref<1x32xf32, #tpu.memory_space<vmem>>, %arg3: memref<32x96xbf16, #tpu.memory_space<vmem>>, %arg4: memref<16x96xf32, #tpu.memory_space<vmem>>) attributes {dimension_semantics = [#tpu.dimension_semantics<arbitrary>], iteration_bounds = array<i64: 1>, scalar_prefetch = 0 : i64, scratch_operands = 0 : i64, tpu.core_type = #tpu.core_type<tc>, window_params = [{pipeline_mode = #tpu.pipeline_mode<synchronous>, transform_indices = @transform_0, window_bounds = array<i64: 16, 32>}, {pipeline_mode = #tpu.pipeline_mode<synchronous>, transform_indices = @transform_1, window_bounds = array<i64: 1, 32>}, {pipeline_mode = #tpu.pipeline_mode<synchronous>, transform_indices = @transform_2, window_bounds = array<i64: 32, 96>}, {pipeline_mode = #tpu.pipeline_mode<synchronous>, transform_indices = @transform_3, window_bounds = array<i64: 16, 96>}]} {
    %c0 = arith.constant 0 : index
    %c0_0 = arith.constant 0 : index
    %0 = vector.load %arg1[%c0, %c0_0] : memref<16x32xf32, #tpu.memory_space<vmem>>, vector<16x32xf32>
    %1 = arith.mulf %0, %0 : vector<16x32xf32>
    %cst = arith.constant dense<0.000000e+00> : vector<16xf32>
    %2 = vector.multi_reduction <add>, %1, %cst [1] : vector<16x32xf32> to vector<16xf32>
    %3 = vector.shape_cast %2 : vector<16xf32> to vector<16x1xf32>
    %cst_1 = arith.constant 3.200000e+01 : f32
    %4 = vector.broadcast %cst_1 : f32 to vector<16x1xf32>
    %5 = arith.divf %3, %4 : vector<16x1xf32>
    %cst_2 = arith.constant 9.99999997E-7 : f32
    %6 = vector.broadcast %cst_2 : f32 to vector<16x1xf32>
    %7 = arith.addf %5, %6 : vector<16x1xf32>
    %8 = math.rsqrt %7 : vector<16x1xf32>
    %9 = vector.broadcast %8 : vector<16x1xf32> to vector<16x32xf32>
    %10 = arith.mulf %0, %9 : vector<16x32xf32>
    %c0_3 = arith.constant 0 : index
    %c0_4 = arith.constant 0 : index
    %11 = vector.load %arg2[%c0_3, %c0_4] : memref<1x32xf32, #tpu.memory_space<vmem>>, vector<1x32xf32>
    %12 = vector.broadcast %11 : vector<1x32xf32> to vector<16x32xf32>
    %13 = arith.mulf %10, %12 : vector<16x32xf32>
    %c0_5 = arith.constant 0 : index
    %c0_6 = arith.constant 0 : index
    %14 = vector.load %arg3[%c0_5, %c0_6] : memref<32x96xbf16, #tpu.memory_space<vmem>>, vector<32x96xbf16>
    %15 = arith.truncf %13 : vector<16x32xf32> to vector<16x32xbf16>
    %cst_7 = arith.constant dense<0.000000e+00> : vector<16x96xf32>
    %16 = tpu.matmul %15, %14, %cst_7 {dimension_numbers = #tpu.dot_dimension_numbers<[1], [0], [0], [1], [0, 0, 1, 1], [], []>} : vector<16x32xbf16>, vector<32x96xbf16>, vector<16x96xf32> -> vector<16x96xf32>
    %c0_8 = arith.constant 0 : index
    %c0_9 = arith.constant 0 : index
    %17 = vector.load %arg4[%c0_8, %c0_9] : memref<16x96xf32, #tpu.memory_space<vmem>>, vector<16x96xf32>
    tpu.vector_store %arg4[%c0_8, %c0_9], %16 {strides = array<i32>} : memref<16x96xf32, #tpu.memory_space<vmem>>, vector<16x96xf32>,
    return
  }
  func.func @transform_0(%arg0: i32) -> (i32, i32) {
    %c0_i32 = arith.constant 0 : i32
    %c0_i32_0 = arith.constant 0 : i32
    %c0_i32_1 = arith.constant 0 : i32
    return %c0_i32, %c0_i32_0 : i32, i32
  }
  func.func @transform_1(%arg0: i32) -> (i32, i32) {
    %c0_i32 = arith.constant 0 : i32
    %c0_i32_0 = arith.constant 0 : i32
    %c0_i32_1 = arith.constant 0 : i32
    return %c0_i32, %c0_i32_0 : i32, i32
  }
  func.func @transform_2(%arg0: i32) -> (i32, i32) {
    %c0_i32 = arith.constant 0 : i32
    %c0_i32_0 = arith.constant 0 : i32
    %c0_i32_1 = arith.constant 0 : i32
    return %c0_i32, %c0_i32_0 : i32, i32
  }
  func.func @transform_3(%arg0: i32) -> (i32, i32) {
    %c0_i32 = arith.constant 0 : i32
    %c0_i32_0 = arith.constant 0 : i32
    %c0_i32_1 = arith.constant 0 : i32
    return %c0_i32, %c0_i32_0 : i32, i32
  }
}

module attributes {stable_mosaic.version = 11 : i64} {
  func.func @_final_ln_kernel(%arg0: i32, %arg1: memref<16x32xf32, #tpu.memory_space<vmem>>, %arg2: memref<16x1xf32, #tpu.memory_space<vmem>>, %arg3: memref<1x32xf32, #tpu.memory_space<vmem>>, %arg4: memref<1x32xf32, #tpu.memory_space<vmem>>, %arg5: memref<16x32xf32, #tpu.memory_space<vmem>>) attributes {dimension_semantics = [#tpu.dimension_semantics<arbitrary>], iteration_bounds = array<i64: 1>, scalar_prefetch = 0 : i64, scratch_operands = 0 : i64, tpu.core_type = #tpu.core_type<tc>, window_params = [{pipeline_mode = #tpu.pipeline_mode<synchronous>, transform_indices = @transform_0, window_bounds = array<i64: 16, 32>}, {pipeline_mode = #tpu.pipeline_mode<synchronous>, transform_indices = @transform_1, window_bounds = array<i64: 16, 1>}, {pipeline_mode = #tpu.pipeline_mode<synchronous>, transform_indices = @transform_2, window_bounds = array<i64: 1, 32>}, {pipeline_mode = #tpu.pipeline_mode<synchronous>, transform_indices = @transform_3, window_bounds = array<i64: 1, 32>}, {pipeline_mode = #tpu.pipeline_mode<synchronous>, transform_indices = @transform_4, window_bounds = array<i64: 16, 32>}]} {
    %c0 = arith.constant 0 : index
    %c0_0 = arith.constant 0 : index
    %0 = vector.load %arg1[%c0, %c0_0] : memref<16x32xf32, #tpu.memory_space<vmem>>, vector<16x32xf32>
    %cst = arith.constant dense<0.000000e+00> : vector<16xf32>
    %1 = vector.multi_reduction <add>, %0, %cst [1] : vector<16x32xf32> to vector<16xf32>
    %2 = vector.shape_cast %1 : vector<16xf32> to vector<16x1xf32>
    %cst_1 = arith.constant 3.200000e+01 : f32
    %3 = vector.broadcast %cst_1 : f32 to vector<16x1xf32>
    %4 = arith.divf %2, %3 : vector<16x1xf32>
    %5 = vector.broadcast %4 : vector<16x1xf32> to vector<16x32xf32>
    %6 = arith.subf %0, %5 : vector<16x32xf32>
    %7 = arith.mulf %6, %6 : vector<16x32xf32>
    %cst_2 = arith.constant dense<0.000000e+00> : vector<16xf32>
    %8 = vector.multi_reduction <add>, %7, %cst_2 [1] : vector<16x32xf32> to vector<16xf32>
    %9 = vector.shape_cast %8 : vector<16xf32> to vector<16x1xf32>
    %cst_3 = arith.constant 3.200000e+01 : f32
    %10 = vector.broadcast %cst_3 : f32 to vector<16x1xf32>
    %11 = arith.divf %9, %10 : vector<16x1xf32>
    %cst_4 = arith.constant 9.99999974E-6 : f32
    %12 = vector.broadcast %cst_4 : f32 to vector<16x1xf32>
    %13 = arith.addf %11, %12 : vector<16x1xf32>
    %14 = math.rsqrt %13 : vector<16x1xf32>
    %15 = vector.broadcast %14 : vector<16x1xf32> to vector<16x32xf32>
    %16 = arith.mulf %6, %15 : vector<16x32xf32>
    %c0_5 = arith.constant 0 : index
    %c0_6 = arith.constant 0 : index
    %17 = vector.load %arg3[%c0_5, %c0_6] : memref<1x32xf32, #tpu.memory_space<vmem>>, vector<1x32xf32>
    %18 = vector.broadcast %17 : vector<1x32xf32> to vector<16x32xf32>
    %19 = arith.mulf %16, %18 : vector<16x32xf32>
    %c0_7 = arith.constant 0 : index
    %c0_8 = arith.constant 0 : index
    %20 = vector.load %arg4[%c0_7, %c0_8] : memref<1x32xf32, #tpu.memory_space<vmem>>, vector<1x32xf32>
    %21 = vector.broadcast %20 : vector<1x32xf32> to vector<16x32xf32>
    %22 = arith.addf %19, %21 : vector<16x32xf32>
    %c0_9 = arith.constant 0 : index
    %c0_10 = arith.constant 0 : index
    %23 = vector.load %arg2[%c0_9, %c0_10] : memref<16x1xf32, #tpu.memory_space<vmem>>, vector<16x1xf32>
    %24 = vector.broadcast %23 : vector<16x1xf32> to vector<16x32xf32>
    %25 = arith.mulf %22, %24 : vector<16x32xf32>
    %c0_11 = arith.constant 0 : index
    %c0_12 = arith.constant 0 : index
    %26 = vector.load %arg5[%c0_11, %c0_12] : memref<16x32xf32, #tpu.memory_space<vmem>>, vector<16x32xf32>
    tpu.vector_store %arg5[%c0_11, %c0_12], %25 {strides = array<i32>} : memref<16x32xf32, #tpu.memory_space<vmem>>, vector<16x32xf32>,
    return
  }
  func.func @transform_0(%arg0: i32) -> (i32, i32) {
    %c0_i32 = arith.constant 0 : i32
    %c0_i32_0 = arith.constant 0 : i32
    %c0_i32_1 = arith.constant 0 : i32
    return %c0_i32, %c0_i32_0 : i32, i32
  }
  func.func @transform_1(%arg0: i32) -> (i32, i32) {
    %c0_i32 = arith.constant 0 : i32
    %c0_i32_0 = arith.constant 0 : i32
    %c0_i32_1 = arith.constant 0 : i32
    return %c0_i32, %c0_i32_0 : i32, i32
  }
  func.func @transform_2(%arg0: i32) -> (i32, i32) {
    %c0_i32 = arith.constant 0 : i32
    %c0_i32_0 = arith.constant 0 : i32
    %c0_i32_1 = arith.constant 0 : i32
    return %c0_i32, %c0_i32_0 : i32, i32
  }
  func.func @transform_3(%arg0: i32) -> (i32, i32) {
    %c0_i32 = arith.constant 0 : i32
    %c0_i32_0 = arith.constant 0 : i32
    %c0_i32_1 = arith.constant 0 : i32
    return %c0_i32, %c0_i32_0 : i32, i32
  }
  func.func @transform_4(%arg0: i32) -> (i32, i32) {
    %c0_i32 = arith.constant 0 : i32
    %c0_i32_0 = arith.constant 0 : i32
    %c0_i32_1 = arith.constant 0 : i32
    return %c0_i32, %c0_i32_0 : i32, i32
  }
}

module attributes {stable_mosaic.version = 11 : i64} {
  func.func @_attn_mlp_kernel(%arg0: i32, %arg1: memref<1x8x32xf32, #tpu.memory_space<vmem>>, %arg2: memref<1x4x8x8xf32, #tpu.memory_space<vmem>>, %arg3: memref<1x4x8x8xf32, #tpu.memory_space<vmem>>, %arg4: memref<1x4x8x8xf32, #tpu.memory_space<vmem>>, %arg5: memref<1x1x8xf32, #tpu.memory_space<vmem>>, %arg6: memref<32x32xbf16, #tpu.memory_space<vmem>>, %arg7: memref<1x32xf32, #tpu.memory_space<vmem>>, %arg8: memref<32x64xbf16, #tpu.memory_space<vmem>>, %arg9: memref<64x32xbf16, #tpu.memory_space<vmem>>, %arg10: memref<1x8x32xf32, #tpu.memory_space<vmem>>) attributes {dimension_semantics = [#tpu.dimension_semantics<parallel>], iteration_bounds = array<i64: 2>, scalar_prefetch = 0 : i64, scratch_operands = 0 : i64, tpu.core_type = #tpu.core_type<tc>, window_params = [{transform_indices = @transform_0, window_bounds = array<i64: 1, 8, 32>}, {transform_indices = @transform_1, window_bounds = array<i64: 1, 4, 8, 8>}, {transform_indices = @transform_2, window_bounds = array<i64: 1, 4, 8, 8>}, {transform_indices = @transform_3, window_bounds = array<i64: 1, 4, 8, 8>}, {transform_indices = @transform_4, window_bounds = array<i64: 1, 1, 8>}, {pipeline_mode = #tpu.pipeline_mode<synchronous>, transform_indices = @transform_5, window_bounds = array<i64: 32, 32>}, {pipeline_mode = #tpu.pipeline_mode<synchronous>, transform_indices = @transform_6, window_bounds = array<i64: 1, 32>}, {pipeline_mode = #tpu.pipeline_mode<synchronous>, transform_indices = @transform_7, window_bounds = array<i64: 32, 64>}, {pipeline_mode = #tpu.pipeline_mode<synchronous>, transform_indices = @transform_8, window_bounds = array<i64: 64, 32>}, {transform_indices = @transform_9, window_bounds = array<i64: 1, 8, 32>}]} {
    %c0 = arith.constant 0 : index
    %c0_0 = arith.constant 0 : index
    %c0_1 = arith.constant 0 : index
    %0 = vector.load %arg1[%c0, %c0_0, %c0_1] : memref<1x8x32xf32, #tpu.memory_space<vmem>>, vector<1x8x32xf32>
    %1 = vector.shape_cast %0 : vector<1x8x32xf32> to vector<8x32xf32>
    %c0_2 = arith.constant 0 : index
    %c0_3 = arith.constant 0 : index
    %c0_4 = arith.constant 0 : index
    %c0_5 = arith.constant 0 : index
    %2 = vector.load %arg2[%c0_2, %c0_3, %c0_4, %c0_5] : memref<1x4x8x8xf32, #tpu.memory_space<vmem>>, vector<1x4x8x8xf32>
    %3 = vector.shape_cast %2 : vector<1x4x8x8xf32> to vector<4x8x8xf32>
    %4 = arith.truncf %3 : vector<4x8x8xf32> to vector<4x8x8xbf16>
    %c0_6 = arith.constant 0 : index
    %c0_7 = arith.constant 0 : index
    %c0_8 = arith.constant 0 : index
    %c0_9 = arith.constant 0 : index
    %5 = vector.load %arg3[%c0_6, %c0_7, %c0_8, %c0_9] : memref<1x4x8x8xf32, #tpu.memory_space<vmem>>, vector<1x4x8x8xf32>
    %6 = vector.shape_cast %5 : vector<1x4x8x8xf32> to vector<4x8x8xf32>
    %7 = arith.truncf %6 : vector<4x8x8xf32> to vector<4x8x8xbf16>
    %c0_10 = arith.constant 0 : index
    %c0_11 = arith.constant 0 : index
    %c0_12 = arith.constant 0 : index
    %c0_13 = arith.constant 0 : index
    %8 = vector.load %arg4[%c0_10, %c0_11, %c0_12, %c0_13] : memref<1x4x8x8xf32, #tpu.memory_space<vmem>>, vector<1x4x8x8xf32>
    %9 = vector.shape_cast %8 : vector<1x4x8x8xf32> to vector<4x8x8xf32>
    %10 = arith.truncf %9 : vector<4x8x8xf32> to vector<4x8x8xbf16>
    "tpu.trace_start"() <{level = 10 : i32, message = "hqd,hkd->hqk"}> : () -> ()
    %cst = arith.constant dense<0.000000e+00> : vector<4x8x8xf32>
    %11 = tpu.matmul %4, %7, %cst {dimension_numbers = #tpu.dot_dimension_numbers<[2], [2], [1], [1], [0, 0, 0, 1, 1, 1], [0], [0]>} : vector<4x8x8xbf16>, vector<4x8x8xbf16>, vector<4x8x8xf32> -> vector<4x8x8xf32>
    "tpu.trace_stop"() : () -> ()
    %cst_14 = arith.constant 0.353553385 : f32
    %12 = vector.broadcast %cst_14 : f32 to vector<4x8x8xf32>
    %13 = arith.mulf %11, %12 : vector<4x8x8xf32>
    %c0_15 = arith.constant 0 : index
    %c0_16 = arith.constant 0 : index
    %c0_17 = arith.constant 0 : index
    %14 = vector.load %arg5[%c0_15, %c0_16, %c0_17] : memref<1x1x8xf32, #tpu.memory_space<vmem>>, vector<1x1x8xf32>
    %15 = vector.shape_cast %14 : vector<1x1x8xf32> to vector<1x8xf32>
    %cst_18 = arith.constant 1.000000e+00 : f32
    %16 = vector.broadcast %cst_18 : f32 to vector<1x8xf32>
    %17 = arith.subf %15, %16 : vector<1x8xf32>
    %cst_19 = arith.constant 1.000000e+09 : f32
    %18 = vector.broadcast %cst_19 : f32 to vector<1x8xf32>
    %19 = arith.mulf %17, %18 : vector<1x8xf32>
    %20 = vector.shape_cast %19 : vector<1x8xf32> to vector<1x1x8xf32>
    %21 = vector.broadcast %20 : vector<1x1x8xf32> to vector<4x8x8xf32>
    %22 = arith.addf %13, %21 : vector<4x8x8xf32>
    %cst_20 = arith.constant dense<0xFF800000> : vector<4x8xf32>
    %23 = vector.multi_reduction <maximumf>, %22, %cst_20 [2] : vector<4x8x8xf32> to vector<4x8xf32>
    %24 = vector.shape_cast %23 : vector<4x8xf32> to vector<4x8x1xf32>
    %25 = vector.broadcast %24 : vector<4x8x1xf32> to vector<4x8x8xf32>
    %26 = arith.subf %22, %25 : vector<4x8x8xf32>
    %27 = math.exp %26 : vector<4x8x8xf32>
    %cst_21 = arith.constant dense<0.000000e+00> : vector<4x8xf32>
    %28 = vector.multi_reduction <add>, %27, %cst_21 [2] : vector<4x8x8xf32> to vector<4x8xf32>
    %29 = vector.shape_cast %28 : vector<4x8xf32> to vector<4x8x1xf32>
    %30 = tpu.reciprocal %29 {approx = true} : vector<4x8x1xf32> -> vector<4x8x1xf32>
    %31 = vector.broadcast %30 : vector<4x8x1xf32> to vector<4x8x8xf32>
    %32 = arith.mulf %27, %31 : vector<4x8x8xf32>
    %33 = arith.truncf %32 : vector<4x8x8xf32> to vector<4x8x8xbf16>
    "tpu.trace_start"() <{level = 10 : i32, message = "hqk,hkd->hqd"}> : () -> ()
    %cst_22 = arith.constant dense<0.000000e+00> : vector<4x8x8xf32>
    %34 = tpu.matmul %33, %10, %cst_22 {dimension_numbers = #tpu.dot_dimension_numbers<[2], [1], [1], [2], [0, 0, 0, 1, 1, 2], [0], [0]>} : vector<4x8x8xbf16>, vector<4x8x8xbf16>, vector<4x8x8xf32> -> vector<4x8x8xf32>
    "tpu.trace_stop"() : () -> ()
    %35 = vector.extract_strided_slice %34 {offsets = [0, 0, 0], sizes = [1, 8, 8], strides = [1, 1, 1]} : vector<4x8x8xf32> to vector<1x8x8xf32>
    %36 = vector.shape_cast %35 : vector<1x8x8xf32> to vector<8x8xf32>
    %c0_23 = arith.constant 0 : index
    %c0_24 = arith.constant 0 : index
    %37 = vector.load %arg6[%c0_23, %c0_24] : memref<32x32xbf16, #tpu.memory_space<vmem>>, vector<8x32xbf16>
    %38 = arith.truncf %36 : vector<8x8xf32> to vector<8x8xbf16>
    %cst_25 = arith.constant dense<0.000000e+00> : vector<8x32xf32>
    %39 = tpu.matmul %38, %37, %cst_25 {dimension_numbers = #tpu.dot_dimension_numbers<[1], [0], [0], [1], [0, 0, 1, 1], [], []>} : vector<8x8xbf16>, vector<8x32xbf16>, vector<8x32xf32> -> vector<8x32xf32>
    %40 = arith.addf %1, %39 : vector<8x32xf32>
    %41 = vector.extract_strided_slice %34 {offsets = [1, 0, 0], sizes = [1, 8, 8], strides = [1, 1, 1]} : vector<4x8x8xf32> to vector<1x8x8xf32>
    %42 = vector.shape_cast %41 : vector<1x8x8xf32> to vector<8x8xf32>
    %c8 = arith.constant 8 : index
    %c0_26 = arith.constant 0 : index
    %43 = vector.load %arg6[%c8, %c0_26] : memref<32x32xbf16, #tpu.memory_space<vmem>>, vector<8x32xbf16>
    %44 = arith.truncf %42 : vector<8x8xf32> to vector<8x8xbf16>
    %cst_27 = arith.constant dense<0.000000e+00> : vector<8x32xf32>
    %45 = tpu.matmul %44, %43, %cst_27 {dimension_numbers = #tpu.dot_dimension_numbers<[1], [0], [0], [1], [0, 0, 1, 1], [], []>} : vector<8x8xbf16>, vector<8x32xbf16>, vector<8x32xf32> -> vector<8x32xf32>
    %46 = arith.addf %40, %45 : vector<8x32xf32>
    %47 = vector.extract_strided_slice %34 {offsets = [2, 0, 0], sizes = [1, 8, 8], strides = [1, 1, 1]} : vector<4x8x8xf32> to vector<1x8x8xf32>
    %48 = vector.shape_cast %47 : vector<1x8x8xf32> to vector<8x8xf32>
    %c16 = arith.constant 16 : index
    %c0_28 = arith.constant 0 : index
    %49 = vector.load %arg6[%c16, %c0_28] : memref<32x32xbf16, #tpu.memory_space<vmem>>, vector<8x32xbf16>
    %50 = arith.truncf %48 : vector<8x8xf32> to vector<8x8xbf16>
    %cst_29 = arith.constant dense<0.000000e+00> : vector<8x32xf32>
    %51 = tpu.matmul %50, %49, %cst_29 {dimension_numbers = #tpu.dot_dimension_numbers<[1], [0], [0], [1], [0, 0, 1, 1], [], []>} : vector<8x8xbf16>, vector<8x32xbf16>, vector<8x32xf32> -> vector<8x32xf32>
    %52 = arith.addf %46, %51 : vector<8x32xf32>
    %53 = vector.extract_strided_slice %34 {offsets = [3, 0, 0], sizes = [1, 8, 8], strides = [1, 1, 1]} : vector<4x8x8xf32> to vector<1x8x8xf32>
    %54 = vector.shape_cast %53 : vector<1x8x8xf32> to vector<8x8xf32>
    %c24 = arith.constant 24 : index
    %c0_30 = arith.constant 0 : index
    %55 = vector.load %arg6[%c24, %c0_30] : memref<32x32xbf16, #tpu.memory_space<vmem>>, vector<8x32xbf16>
    %56 = arith.truncf %54 : vector<8x8xf32> to vector<8x8xbf16>
    %cst_31 = arith.constant dense<0.000000e+00> : vector<8x32xf32>
    %57 = tpu.matmul %56, %55, %cst_31 {dimension_numbers = #tpu.dot_dimension_numbers<[1], [0], [0], [1], [0, 0, 1, 1], [], []>} : vector<8x8xbf16>, vector<8x32xbf16>, vector<8x32xf32> -> vector<8x32xf32>
    %58 = arith.addf %52, %57 : vector<8x32xf32>
    %59 = arith.mulf %58, %58 : vector<8x32xf32>
    %cst_32 = arith.constant dense<0.000000e+00> : vector<8xf32>
    %60 = vector.multi_reduction <add>, %59, %cst_32 [1] : vector<8x32xf32> to vector<8xf32>
    %61 = vector.shape_cast %60 : vector<8xf32> to vector<8x1xf32>
    %cst_33 = arith.constant 3.200000e+01 : f32
    %62 = vector.broadcast %cst_33 : f32 to vector<8x1xf32>
    %63 = arith.divf %61, %62 : vector<8x1xf32>
    %cst_34 = arith.constant 9.99999997E-7 : f32
    %64 = vector.broadcast %cst_34 : f32 to vector<8x1xf32>
    %65 = arith.addf %63, %64 : vector<8x1xf32>
    %66 = math.rsqrt %65 : vector<8x1xf32>
    %67 = vector.broadcast %66 : vector<8x1xf32> to vector<8x32xf32>
    %68 = arith.mulf %58, %67 : vector<8x32xf32>
    %c0_35 = arith.constant 0 : index
    %c0_36 = arith.constant 0 : index
    %69 = vector.load %arg7[%c0_35, %c0_36] : memref<1x32xf32, #tpu.memory_space<vmem>>, vector<1x32xf32>
    %70 = vector.broadcast %69 : vector<1x32xf32> to vector<8x32xf32>
    %71 = arith.mulf %68, %70 : vector<8x32xf32>
    %c0_37 = arith.constant 0 : index
    %c0_38 = arith.constant 0 : index
    %72 = vector.load %arg8[%c0_37, %c0_38] : memref<32x64xbf16, #tpu.memory_space<vmem>>, vector<32x64xbf16>
    %73 = arith.truncf %71 : vector<8x32xf32> to vector<8x32xbf16>
    %cst_39 = arith.constant dense<0.000000e+00> : vector<8x64xf32>
    %74 = tpu.matmul %73, %72, %cst_39 {dimension_numbers = #tpu.dot_dimension_numbers<[1], [0], [0], [1], [0, 0, 1, 1], [], []>} : vector<8x32xbf16>, vector<32x64xbf16>, vector<8x64xf32> -> vector<8x64xf32>
    %75 = arith.mulf %74, %74 : vector<8x64xf32>
    %76 = arith.mulf %74, %75 : vector<8x64xf32>
    %cst_40 = arith.constant 4.471500e-02 : f32
    %77 = vector.broadcast %cst_40 : f32 to vector<8x64xf32>
    %78 = arith.mulf %77, %76 : vector<8x64xf32>
    %79 = arith.addf %74, %78 : vector<8x64xf32>
    %cst_41 = arith.constant 0.797884583 : f32
    %80 = vector.broadcast %cst_41 : f32 to vector<8x64xf32>
    %81 = arith.mulf %80, %79 : vector<8x64xf32>
    %82 = math.tanh %81 : vector<8x64xf32>
    %cst_42 = arith.constant 1.000000e+00 : f32
    %83 = vector.broadcast %cst_42 : f32 to vector<8x64xf32>
    %84 = arith.addf %83, %82 : vector<8x64xf32>
    %cst_43 = arith.constant 5.000000e-01 : f32
    %85 = vector.broadcast %cst_43 : f32 to vector<8x64xf32>
    %86 = arith.mulf %85, %84 : vector<8x64xf32>
    %87 = arith.mulf %74, %86 : vector<8x64xf32>
    %c0_44 = arith.constant 0 : index
    %c0_45 = arith.constant 0 : index
    %88 = vector.load %arg9[%c0_44, %c0_45] : memref<64x32xbf16, #tpu.memory_space<vmem>>, vector<64x32xbf16>
    %89 = arith.truncf %87 : vector<8x64xf32> to vector<8x64xbf16>
    %cst_46 = arith.constant dense<0.000000e+00> : vector<8x32xf32>
    %90 = tpu.matmul %89, %88, %cst_46 {dimension_numbers = #tpu.dot_dimension_numbers<[1], [0], [0], [1], [0, 0, 1, 1], [], []>} : vector<8x64xbf16>, vector<64x32xbf16>, vector<8x32xf32> -> vector<8x32xf32>
    %91 = arith.addf %58, %90 : vector<8x32xf32>
    %c0_47 = arith.constant 0 : index
    %c0_48 = arith.constant 0 : index
    %c0_49 = arith.constant 0 : index
    %92 = vector.load %arg10[%c0_47, %c0_48, %c0_49] : memref<1x8x32xf32, #tpu.memory_space<vmem>>, vector<1x8x32xf32>
    %93 = vector.shape_cast %92 : vector<1x8x32xf32> to vector<8x32xf32>
    %94 = vector.shape_cast %91 : vector<8x32xf32> to vector<1x8x32xf32>
    tpu.vector_store %arg10[%c0_47, %c0_48, %c0_49], %94 {strides = array<i32>} : memref<1x8x32xf32, #tpu.memory_space<vmem>>, vector<1x8x32xf32>,
    return
  }
  func.func @transform_0(%arg0: i32) -> (i32, i32, i32) {
    %c0_i32 = arith.constant 0 : i32
    %c0_i32_0 = arith.constant 0 : i32
    %c0_i32_1 = arith.constant 0 : i32
    return %arg0, %c0_i32, %c0_i32_0 : i32, i32, i32
  }
  func.func @transform_1(%arg0: i32) -> (i32, i32, i32, i32) {
    %c0_i32 = arith.constant 0 : i32
    %c0_i32_0 = arith.constant 0 : i32
    %c0_i32_1 = arith.constant 0 : i32
    %c0_i32_2 = arith.constant 0 : i32
    return %arg0, %c0_i32, %c0_i32_0, %c0_i32_1 : i32, i32, i32, i32
  }
  func.func @transform_2(%arg0: i32) -> (i32, i32, i32, i32) {
    %c0_i32 = arith.constant 0 : i32
    %c0_i32_0 = arith.constant 0 : i32
    %c0_i32_1 = arith.constant 0 : i32
    %c0_i32_2 = arith.constant 0 : i32
    return %arg0, %c0_i32, %c0_i32_0, %c0_i32_1 : i32, i32, i32, i32
  }
  func.func @transform_3(%arg0: i32) -> (i32, i32, i32, i32) {
    %c0_i32 = arith.constant 0 : i32
    %c0_i32_0 = arith.constant 0 : i32
    %c0_i32_1 = arith.constant 0 : i32
    %c0_i32_2 = arith.constant 0 : i32
    return %arg0, %c0_i32, %c0_i32_0, %c0_i32_1 : i32, i32, i32, i32
  }
  func.func @transform_4(%arg0: i32) -> (i32, i32, i32) {
    %c0_i32 = arith.constant 0 : i32
    %c0_i32_0 = arith.constant 0 : i32
    %c0_i32_1 = arith.constant 0 : i32
    return %arg0, %c0_i32, %c0_i32_0 : i32, i32, i32
  }
  func.func @transform_5(%arg0: i32) -> (i32, i32) {
    %c0_i32 = arith.constant 0 : i32
    %c0_i32_0 = arith.constant 0 : i32
    %c0_i32_1 = arith.constant 0 : i32
    return %c0_i32, %c0_i32_0 : i32, i32
  }
  func.func @transform_6(%arg0: i32) -> (i32, i32) {
    %c0_i32 = arith.constant 0 : i32
    %c0_i32_0 = arith.constant 0 : i32
    %c0_i32_1 = arith.constant 0 : i32
    return %c0_i32, %c0_i32_0 : i32, i32
  }
  func.func @transform_7(%arg0: i32) -> (i32, i32) {
    %c0_i32 = arith.constant 0 : i32
    %c0_i32_0 = arith.constant 0 : i32
    %c0_i32_1 = arith.constant 0 : i32
    return %c0_i32, %c0_i32_0 : i32, i32
  }
  func.func @transform_8(%arg0: i32) -> (i32, i32) {
    %c0_i32 = arith.constant 0 : i32
    %c0_i32_0 = arith.constant 0 : i32
    %c0_i32_1 = arith.constant 0 : i32
    return %c0_i32, %c0_i32_0 : i32, i32
  }
  func.func @transform_9(%arg0: i32) -> (i32, i32, i32) {
    %c0_i32 = arith.constant 0 : i32
    %c0_i32_0 = arith.constant 0 : i32
    %c0_i32_1 = arith.constant 0 : i32
    return %arg0, %c0_i32, %c0_i32_0 : i32, i32, i32
  }
}

</mosaic_0001>

<bundles_post_ra>
// kernel: model_forward.9
= control target key start
LH: loop header
LB: loop body
LE: loop exit
PB: predicated region body
PF: predicated region fallthrough
CT: control target
= control target key end

     0   :  { %vm20_vm0 = vcmask 261120   ;;  %s188_s0 = inlined_call_operand.vmem [shape: f32[16,32], index: 0, kind: input, shape index: {}]   ;;  %s189_s1 = inlined_call_operand.vmem [shape: f32[16,1], index: 1, kind: input, shape index: {}]   ;;  %s190_s2 = inlined_call_operand.vmem [shape: f32[1,32], index: 2, kind: input, shape index: {}]   ;;  %s191_s3 = inlined_call_operand.vmem [shape: f32[1,32], index: 3, kind: input, shape index: {}]   ;;  %s192_s4 = inlined_call_operand.hbm [shape: f32[16,32], index: 4, kind: output, shape index: {}]  }
   0x1   :  { %v18_v0 = vld [vmem:[%s188_s0] sm:$0xff]  ;;  %v19_v1 = vld [vmem:[%s188_s0 + $0x8] sm:$0xff] }
   0x2   :  { %9 = vsyncpa [#allocation3], 0  ;;  %v21_v2 = vsel %vm20_vm0, %v18_v0, 0.0  ;;  %v24_v3 = vsel %vm20_vm0, %v19_v1, 0.0  ;;  %v132_v4 = vmov 0   ;;  %v66_v5 = vld [vmem:[%s189_s1] sm:$0xff] }
   0x3   :  { %22 = vadd.xlane.f32.xlu0 %v21_v2  ;;  %105 = vset.pattern.permute.xlu1 %v132_v4  ;;  %v67_v16 = vld [vmem:[%s189_s1 + $0x8] sm:$0xff]  ;;  %v98_v24 = vld [vmem:[%s190_s2] ss:$0 sm:$0xff]  ;;  %s133_s1 = smov [#allocation2]  }
   0x4   :  { %104 = vset.pattern.permute.xlu0 %v132_v4  ;;  %v99_v26 = vld [vmem:[%s191_s3] ss:$0 sm:$0xff]  ;;  %s87_s26 = sshll.u32 %s133_s1, 4  ;;  %s88_s26 = int_to_ptr.vmem [resolvable:$true] %s87_s26 }
   0x5   :  { %s110_s2 = scalar_lea.vmem %s88_s26, 256  ;;  %p115_p1 = scmp.lt.s32.totalorder %s88_s26, %s88_s26 }
   0x6   :  { %p111_p0 = scmp.ne.s32.totalorder %s88_s26, %s110_s2  ;;  %p116_p2 = scmp.lt.s32.totalorder %s110_s2, %s110_s2 }
   0x7   :  { %25 = vadd.xlane.f32.xlu0 %v24_v3 }
   0x8   :  { %p117_p3 = por %p116_p2, %p115_p1 }
   0xa   :  { %p118_p4 = pnand %p117_p3, %p111_p0 }
  0x1d   :  { %70 = vperm.xlu0 %104, %v66_v5  }
  0x8c   :  { %v23_v6 = vpop.xlane.xlu0 %22 }
  0x8d   :  { %v28_v7 = vmul.f32 0.03125, %v23_v6 }
  0x8f   :  { %v30_v8 = vsub.f32 %v18_v0, %v28_v7 }
  0x90   :  { %v26_v9 = vpop.xlane.xlu0 %25 }
  0x91   :  { %v29_v10 = vmul.f32 0.03125, %v26_v9  ;;  %v32_v11 = vmul.f32 %v30_v8, %v30_v8 }
  0x93   :  { %v31_v12 = vsub.f32 %v19_v1, %v29_v10  ;;  %v34_v13 = vsel %vm20_vm0, %v32_v11, 0.0 }
  0x94   :  { %35 = vadd.xlane.f32.xlu1 %v34_v13 }
  0x95   :  { %v33_v14 = vmul.f32 %v31_v12, %v31_v12 }
  0x97   :  { %v37_v15 = vsel %vm20_vm0, %v33_v14, 0.0 }
  0x98   :  { %38 = vadd.xlane.f32.xlu1 %v37_v15  ;;  %v71_v29 = vpop.permute.xlu0 %70 }
  0xa9   :  { %75 = vperm.xlu1 %105, %v67_v16  }
 0x11d   :  { %v36_v17 = vpop.xlane.xlu1 %35 }
 0x11e   :  { %v40_v18 = vmul.f32 0.03125, %v36_v17 }
 0x120   :  { %v42_v19 = vadd.f32 1e-05, %v40_v18 }
 0x121   :  { %v39_v20 = vpop.xlane.xlu1 %38 }
 0x122   :  { %106 = vrsqrt.f32 %v42_v19  ;;  %v41_v21 = vmul.f32 0.03125, %v39_v20 }
 0x124   :  { %v43_v22 = vadd.f32 1e-05, %v41_v21 }
 0x125   :  { %v76_v34 = vpop.permute.xlu1 %75 }
 0x126   :  { %108 = vrsqrt.f32 %v43_v22 }
 0x12f   :  { %v107_v23 = vpop.eup %106 }
 0x130   :  { %v46_v25 = vmul.f32 %v107_v23, %v30_v8 }
 0x132   :  { %v55_v27 = vmul.f32 %v98_v24, %v46_v25 }
 0x133   :  { %v109_v28 = vpop.eup %108 }
 0x134   :  { %v64_v30 = vadd.f32 %v99_v26, %v55_v27  ;;  %v47_v31 = vmul.f32 %v109_v28, %v31_v12 }
 0x136   :  { %v78_v32 = vmul.f32 %v71_v29, %v64_v30  ;;  %v56_v33 = vmul.f32 %v98_v24, %v47_v31 }
 0x138   :  { %80 = vst.msk [vmem:[#allocation2] sm:$0xff] %vm20_vm0, %v78_v32  ;;  %v65_v35 = vadd.f32 %v99_v26, %v56_v33 }
 0x13a   :  { %v79_v36 = vmul.f32 %v76_v34, %v65_v35 }
 0x13c   :  { %81 = vst.msk [vmem:[#allocation2 + $0x8] sm:$0xff] %vm20_vm0, %v79_v36 }
 0x13d   :  { %121 = shalt.err (!%p118_p4)
}
 0x13e   :  { %s134_s3 = smov 128   ;;  %s135_s27 = smov 8  }
 0x13f   :  { %93 = dma.vmem_to_hbm [thread:$0]  %s88_s26, 256, %s192_s4, [#allocation3], %s134_s3, %s134_s3, %s135_s27  }
 0x140   :  { %130 = dma.done.wait [#allocation3], 256  }
 0x141   :  { %131 = vsyncadd [#allocation3], 4294967040 }
 0x142   :  { %97 = vsyncpa [#allocation3], 1 }

// kernel: model_forward.5
= control target key start
LH: loop header
LB: loop body
LE: loop exit
PB: predicated region body
PF: predicated region fallthrough
CT: control target
= control target key end

     0   :  { %vm19_vm0 = vcmask 261120   ;;  %v135_v6 = vmov 0.0   ;;  %vm136_vm1 = vmmov 0   ;;  %vm105_vm2 = vcmask 785408   ;;  %s181_s0 = inlined_call_operand.vmem [shape: f32[16,32], index: 0, kind: input, shape index: {}]   ;;  %s182_s2 = inlined_call_operand.vmem [shape: bf16[32,96], index: 2, kind: input, shape index: {}]   ;;  %s183_s1 = inlined_call_operand.vmem [shape: f32[1,32], index: 1, kind: input, shape index: {}]   ;;  %s184_s3 = inlined_call_operand.vmem [shape: f32[16,96], index: 3, kind: output, shape index: {}]  }
   0x1   :  { %v15_v0 = vld [vmem:[%s181_s0] sm:$0xff]  ;;  %v16_v1 = vld [vmem:[%s181_s0 + $0x8] sm:$0xff]  ;;  %119 = vmatprep.subr.bf16.mxu0 %v135_v6  ;;  %123 = vmatprep.mubr.msk.bf16.mxu0 %vm136_vm1, %v135_v6 }
   0x2   :  { %v17_v2 = vmul.f32 %v15_v0, %v15_v0  ;;  %v18_v3 = vmul.f32 %v16_v1, %v16_v1  ;;  %v129_v7 = vld [vmem:[%s182_s2 + $0x8] sm:$0xff]   ;;  %v130_v8 = vld [vmem:[%s182_s2] sm:$0xff]  }
   0x3   :  { %120 = vmatpush3.bf16.msra.mxu0 %v129_v7  ;;  %v112_v18 = vld [vmem:[%s183_s1] ss:$0 sm:$0xff] }
   0x4   :  { %v20_v4 = vsel %vm19_vm0, %v17_v2, 0.0  ;;  %v23_v5 = vsel %vm19_vm0, %v18_v3, 0.0  ;;  %121 = vmatprep.subr.bf16.mxu0 %v135_v6 }
   0x5   :  { %21 = vadd.xlane.f32.xlu0 %v20_v4 }
   0x7   :  { %122 = vmatpush3.bf16.msra.mxu0 %v130_v8 }
   0x9   :  { %24 = vadd.xlane.f32.xlu0 %v23_v5 }
  0x8e   :  { %v22_v9 = vpop.xlane.xlu0 %21 }
  0x8f   :  { %v27_v10 = vmul.f32 0.03125, %v22_v9 }
  0x91   :  { %v29_v11 = vadd.f32 1e-06, %v27_v10 }
  0x92   :  { %v25_v12 = vpop.xlane.xlu0 %24 }
  0x93   :  { %131 = vrsqrt.f32 %v29_v11  ;;  %v28_v13 = vmul.f32 0.03125, %v25_v12 }
  0x95   :  { %v30_v14 = vadd.f32 1e-06, %v28_v13 }
  0x97   :  { %133 = vrsqrt.f32 %v30_v14 }
  0xa0   :  { %v132_v15 = vpop.eup %131 }
  0xa1   :  { %v33_v16 = vmul.f32 %v132_v15, %v15_v0 }
  0xa3   :  { %v42_v20 = vmul.f32 %v112_v18, %v33_v16 }
  0xa4   :  { %v134_v17 = vpop.eup %133 }
  0xa5   :  { %v34_v19 = vmul.f32 %v134_v17, %v16_v1 }
  0xa7   :  { %v43_v21 = vmul.f32 %v112_v18, %v34_v19 }
  0xa9   :  { %v48_v22 = vpack.c.bf16 %v43_v21, %v42_v20 }
  0xab   :  { %124 = vmatmul.mubr.msk.bf16.vlgmr.msra.gmra.mxu0 %vm19_vm0, %v48_v22 }
 0x16b   :  { %v98_v23 = vpop.f32.mrf.mxu0 }
 0x16c   :  { %106 = vst.msk [vmem:[%s184_s3] sm:$0xff] %vm105_vm2, %v98_v23 }
 0x16d   :  { %v125_v24 = vpop.f32.mrf.mxu0 }
 0x16f   :  { %v101_v25 = vpop.f32.mrf.mxu0 }
 0x170   :  { %107 = vst.msk [vmem:[%s184_s3 + $0x8] sm:$0xff] %vm105_vm2, %v101_v25 }
 0x171   :  { %v126_v26 = vpop.f32.mrf.mxu0 }

// kernel: model_forward.6
= control target key start
LH: loop header
LB: loop body
LE: loop exit
PB: predicated region body
PF: predicated region fallthrough
CT: control target
= control target key end

     0   :  { %s1583_s30 = smov 0   ;;  %s1740_s0 = inlined_call_operand.vmem [shape: f32[2,8,32], index: 0, kind: input, shape index: {}]   ;;  %s1741_s1 = inlined_call_operand.vmem [shape: f32[2,4,8,8], index: 1, kind: input, shape index: {}]   ;;  %s1742_s2 = inlined_call_operand.vmem [shape: f32[2,4,8,8], index: 2, kind: input, shape index: {}]   ;;  %s1743_s3 = inlined_call_operand.vmem [shape: f32[2,4,8,8], index: 3, kind: input, shape index: {}]   ;;  %s1744_s4 = inlined_call_operand.vmem [shape: f32[2,1,8], index: 4, kind: input, shape index: {}]   ;;  %s1745_s5 = inlined_call_operand.vmem [shape: bf16[32,32], index: 5, kind: input, shape index: {}]   ;;  %s1746_s6 = inlined_call_operand.vmem [shape: f32[1,32], index: 6, kind: input, shape index: {}]   ;;  %s1747_s7 = inlined_call_operand.vmem [shape: bf16[32,64], index: 7, kind: input, shape index: {}]   ;;  %s1748_s8 = inlined_call_operand.vmem [shape: bf16[64,32], index: 8, kind: input, shape index: {}]   ;;  %s1749_s9 = inlined_call_operand.vmem [shape: f32[2,8,32], index: 9, kind: output, shape index: {}]  }
   0x1 LB: > { %s1323_s10 = sadd.s32 4294967295, %s1529_s30   ;;  %p1327_p0 = scmp.ge.s32.totalorder %s1529_s30, 1  ;;  %s1529_s30 = sphi %s1583_s30, %s19_s30  }
   0x2   : > { %p324_p1 = scmp.lt.s32.totalorder %s1529_s30, 3 }
   0x4   : > { %p325_p2 = pnand %p1327_p0, %p324_p1 }
   0x5   : > { %p376_p3 = scmp.lt.s32.totalorder (!%p325_p2), %s1323_s10, 1 }
   0x6   : > { %328 = sbr.rel (%p325_p2) target bundleno = 1527 (0x5f7), region = 56 }
   0xb   : > { %v1531_v0 = vmov 0.0   ;;  %s1751_s10 = smov (!%p376_p3, %s1323_s10), 1  ;;  %vm1532_vm0 = vmmov 0   ;;  %vm428_vm1 = vcmask 64512   ;;  %v621_v21 = vlaneseq }
   0xc   : > { %1395 = vmatprep.subr.bf16.mxu0 %v1531_v0  ;;  %1401 = vmatprep.subr.bf16.mxu1 %v1531_v0  ;;  %s1600_s11 = sshll.u32 %s1751_s10, 5  ;;  %s397_s20 = scalar_lea.vmem %s1744_s4, %s1751_s10  ;;  %vm681_vm2 = vcmask 1043456   ;;  %vm1060_vm3 = vcmask 261120   ;;  %vm1179_vm4 = vcmask 523264  }
   0xd   : > { %1397 = vmatprep.mubr.msk.bf16.mxu0 %vm1532_vm0, %v1531_v0  ;;  %1403 = vmatprep.mubr.msk.bf16.mxu1 %vm1532_vm0, %v1531_v0  ;;  %s389_s14 = scalar_lea.vmem %s1742_s2, %s1600_s11  ;;  %s384_s17 = scalar_lea.vmem %s1741_s1, %s1600_s11  ;;  %v617_v22 = vld [vmem:[%s397_s20] sm:$0x1]  ;;  %v622_v24 = vshrl.u32 %v621_v21, 7 }
   0xe   : > { %v412_v1 = vld [vmem:[%s389_s14] sm:$0xff]  ;;  %v413_v2 = vld [vmem:[%s389_s14 + $0x8] sm:$0xff]  ;;  %v414_v5 = vld [vmem:[%s389_s14 + $0x10] sm:$0xff]  ;;  %v1340_v23 = vadd.f32 -1.0, %v617_v22  ;;  %s394_s23 = scalar_lea.vmem %s1743_s3, %s1600_s11  ;;  %s1328_s13 = sshll.u32 %s1751_s10, 3 }
   0xf   : > { %v416_v3 = vpack.c.bf16 %v412_v1, %v412_v1  ;;  %v417_v4 = vpack.c.bf16 %v413_v2, %v413_v2  ;;  %v415_v6 = vld [vmem:[%s389_s14 + $0x18] sm:$0xff]  ;;  %v404_v9 = vld [vmem:[%s384_s17] sm:$0xff]  ;;  %v405_v10 = vld [vmem:[%s384_s17 + $0x8] sm:$0xff]  ;;  %v418_v11 = vpack.c.bf16 %v414_v5, %v414_v5  ;;  %v623_v26 = vsub.s32 0, %v622_v24  ;;  %s379_s16 = scalar_lea.vmem %s1740_s0, %s1328_s13  ;;  %s401_s15 = scalar_lea.vmem %s1749_s9, %s1328_s13 }
  0x10   : > { %v419_v12 = vpack.c.bf16 %v415_v6, %v415_v6  ;;  %v408_v13 = vpack.c.bf16 %v404_v9, %v404_v9  ;;  %v409_v14 = vpack.c.bf16 %v405_v10, %v405_v10  ;;  %v406_v17 = vld [vmem:[%s384_s17 + $0x10] sm:$0xff]  ;;  %v407_v18 = vld [vmem:[%s384_s17 + $0x18] sm:$0xff]  ;;  %v619_v25 = vmul.f32 1e+09, %v1340_v23 }
  0x11   : > { %v433_v7 = vsel %vm428_vm1, %v416_v3, 0  ;;  %v479_v8 = vsel %vm428_vm1, %v417_v4, 0  ;;  %v525_v15 = vsel %vm428_vm1, %v418_v11, 0  ;;  %v410_v19 = vpack.c.bf16 %v406_v17, %v406_v17  ;;  %v422_v22 = vld [vmem:[%s394_s23 + $0x10] sm:$0xff] }
  0x12   : > { %1396 = vmatpush3.bf16.xpose.msra.mxu0 %v433_v7  ;;  %1402 = vmatpush3.bf16.xpose.msra.mxu1 %v479_v8  ;;  %v571_v16 = vsel %vm428_vm1, %v419_v12, 0  ;;  %v411_v20 = vpack.c.bf16 %v407_v18, %v407_v18  ;;  %v624_v27 = vrot.slane %v619_v25, %v623_v26  ;;  %v426_v24 = vpack.c.bf16 %v422_v22, %v422_v22  ;;  %v423_v26 = vld [vmem:[%s394_s23 + $0x18] sm:$0xff] }
  0x13   : > { %1407 = vmatprep.subr.bf16.mxu0 %v1531_v0  ;;  %1413 = vmatprep.subr.bf16.mxu1 %v1531_v0 }
  0x19   : > { %1398 = vmatmul.mubr.msk.bf16.vlgmr.msra.gmra.mxu0 %vm428_vm1, %v408_v13  ;;  %1404 = vmatmul.mubr.msk.bf16.vlgmr.msra.gmra.mxu1 %vm428_vm1, %v409_v14  ;;  %v420_v13 = vld [vmem:[%s394_s23] sm:$0xff] }
  0x1a   : > { %1408 = vmatpush3.bf16.xpose.msra.mxu0 %v525_v15  ;;  %1414 = vmatpush3.bf16.xpose.msra.mxu1 %v571_v16  ;;  %v424_v14 = vpack.c.bf16 %v420_v13, %v420_v13  ;;  %v421_v15 = vld [vmem:[%s394_s23 + $0x8] sm:$0xff] }
  0x1b   : > { %1409 = vmatprep.mubr.msk.bf16.mxu0 %vm1532_vm0, %v1531_v0  ;;  %1415 = vmatprep.mubr.msk.bf16.mxu1 %vm1532_vm0, %v1531_v0  ;;  %v425_v16 = vpack.c.bf16 %v421_v15, %v421_v15 }
  0x1c   : > { %1419 = vmatprep.subr.bf16.mxu0 %v1531_v0  ;;  %1425 = vmatprep.subr.bf16.mxu1 %v1531_v0  ;;  %v683_v17 = vsel %vm681_vm2, %v424_v14, 0 }
  0x1d   : > { %v729_v18 = vsel %vm681_vm2, %v425_v16, 0 }
  0x21   : > { %1410 = vmatmul.mubr.msk.bf16.vlgmr.msra.gmra.mxu0 %vm428_vm1, %v410_v19  ;;  %1416 = vmatmul.mubr.msk.bf16.vlgmr.msra.gmra.mxu1 %vm428_vm1, %v411_v20 }
  0x22   : > { %1421 = vmatprep.mubr.msk.bf16.mxu0 %vm1532_vm0, %v1531_v0  ;;  %1427 = vmatprep.mubr.msk.bf16.mxu1 %vm1532_vm0, %v1531_v0 }
  0x23   : > { %1420 = vmatpush3.bf16.msra.mxu0 %v683_v17  ;;  %1426 = vmatpush3.bf16.msra.mxu1 %v729_v18 }
  0x24   : > { %1431 = vmatprep.subr.bf16.mxu0 %v1531_v0  ;;  %1437 = vmatprep.subr.bf16.mxu1 %v1531_v0 }
  0xd9   : > { %v469_v28 = vpop.f32.mrf.mxu0  ;;  %v515_v29 = vpop.f32.mrf.mxu1 }
  0xda   : > { %v613_v30 = vmul.f32 0.35355338, %v469_v28  ;;  %v614_v31 = vmul.f32 0.35355338, %v515_v29  ;;  %v775_v29 = vsel %vm681_vm2, %v426_v24, 0 }
  0xdb   : > { %v1399_v32 = vpop.f32.mrf.mxu0  ;;  %v1405_v33 = vpop.f32.mrf.mxu1 }
  0xdc   : > { %v626_v34 = vadd.f32 %v624_v27, %v613_v30  ;;  %v627_v35 = vadd.f32 %v624_v27, %v614_v31  ;;  %v427_v30 = vpack.c.bf16 %v423_v26, %v423_v26 }
  0xdd   : > { %v472_v36 = vpop.f32.mrf.mxu0  ;;  %v518_v37 = vpop.f32.mrf.mxu1 }
  0xde   : > { %v630_v38 = vsel %vm428_vm1, %v626_v34, -inf  ;;  %v633_v41 = vsel %vm428_vm1, %v627_v35, -inf  ;;  %v863_v36 = vld [vmem:[%s1745_s5] sm:$0xf] }
  0xdf   : > { %v1406_v39 = vpop.f32.mrf.mxu1  ;;  %631 = vmax.xlane.f32.xlu0 %v630_v38  ;;  %v1400_v40 = vpop.f32.mrf.mxu0 }
  0xe0   : > { %v869_v39 = vsel %vm681_vm2, %v863_v36, 0 }
  0xe1   : > { %v561_v42 = vpop.f32.mrf.mxu0  ;;  %v607_v43 = vpop.f32.mrf.mxu1 }
  0xe2   : > { %v615_v44 = vmul.f32 0.35355338, %v561_v42  ;;  %v616_v45 = vmul.f32 0.35355338, %v607_v43  ;;  %v912_v43 = vld [vmem:[%s1745_s5 + $0x4] sm:$0xf] }
  0xe3   : > { %v1417_v46 = vpop.f32.mrf.mxu1  ;;  %634 = vmax.xlane.f32.xlu0 %v633_v41  ;;  %v1411_v47 = vpop.f32.mrf.mxu0 }
  0xe4   : > { %v628_v48 = vadd.f32 %v624_v27, %v615_v44  ;;  %v629_v49 = vadd.f32 %v624_v27, %v616_v45  ;;  %v918_v44 = vsel %vm681_vm2, %v912_v43, 0  ;;  %v961_v45 = vld [vmem:[%s1745_s5 + $0x8] sm:$0xf] }
  0xe5   : > { %v564_v50 = vpop.f32.mrf.mxu0  ;;  %v610_v51 = vpop.f32.mrf.mxu1 }
  0xe6   : > { %v636_v52 = vsel %vm428_vm1, %v628_v48, -inf  ;;  %v639_v55 = vsel %vm428_vm1, %v629_v49, -inf  ;;  %v1010_v50 = vld [vmem:[%s1745_s5 + $0xc] sm:$0xf] }
  0xe7   : > { %v1418_v53 = vpop.f32.mrf.mxu1  ;;  %637 = vmax.xlane.f32.xlu1 %v636_v52  ;;  %v1412_v54 = vpop.f32.mrf.mxu0 }
  0xe8   : > { %v1016_v54 = vsel %vm681_vm2, %v1010_v50, 0 }
  0xeb   : > { %640 = vmax.xlane.f32.xlu1 %v639_v55 }
 0x168   : > { %v632_v56 = vpop.xlane.xlu0 %631 }
 0x169   : > { %v642_v57 = vsub.f32 %v626_v34, %v632_v56  ;;  %v821_v34 = vsel %vm681_vm2, %v427_v30, 0  ;;  %v1498_v30 = vld [vmem:[%s1747_s7] sm:$0xff]  }
 0x16b   : > { %v646_v58 = vmul.f32 1.442695, %v642_v57 }
 0x16c   : > { %v635_v59 = vpop.xlane.xlu0 %634 }
 0x16d   : > { %1503 = vpow2.f32 %v646_v58  ;;  %v643_v60 = vsub.f32 %v627_v35, %v635_v59 }
 0x16f   : > { %v648_v61 = vmul.f32 1.442695, %v643_v60 }
 0x170   : > { %v638_v62 = vpop.xlane.xlu1 %637 }
 0x171   : > { %1505 = vpow2.f32 %v648_v61  ;;  %v644_v63 = vsub.f32 %v628_v48, %v638_v62  ;;  %v967_v48 = vsel %vm681_vm2, %v961_v45, 0 }
 0x173   : > { %v650_v1 = vmul.f32 1.442695, %v644_v63 }
 0x174   : > { %v641_v2 = vpop.xlane.xlu1 %640 }
 0x175   : > { %1507 = vpow2.f32 %v650_v1  ;;  %v645_v3 = vsub.f32 %v629_v49, %v641_v2 }
 0x177   : > { %v652_v4 = vmul.f32 1.442695, %v645_v3 }
 0x179   : > { %1509 = vpow2.f32 %v652_v4 }
 0x17a   : > { %v1504_v5 = vpop.eup %1503 }
 0x17b   : > { %v654_v6 = vsel %vm428_vm1, %v1504_v5, 0.0 }
 0x17c   : > { %655 = vadd.xlane.f32.xlu0 %v654_v6 }
 0x17e   : > { %v1506_v7 = vpop.eup %1505 }
 0x17f   : > { %v657_v8 = vsel %vm428_vm1, %v1506_v7, 0.0 }
 0x180   : > { %658 = vadd.xlane.f32.xlu1 %v657_v8  ;;  %v403_v8 = vld [vmem:[%s379_s16] sm:$0xff] }
 0x182   : > { %v1508_v9 = vpop.eup %1507 }
 0x183   : > { %v660_v10 = vsel %vm428_vm1, %v1508_v9, 0.0 }
 0x184   : > { %661 = vadd.xlane.f32.xlu0 %v660_v10 }
 0x186   : > { %v1510_v11 = vpop.eup %1509 }
 0x187   : > { %v663_v12 = vsel %vm428_vm1, %v1510_v11, 0.0 }
 0x188   : > { %664 = vadd.xlane.f32.xlu1 %v663_v12 }
 0x205   : > { %v656_v19 = vpop.xlane.xlu0 %655 }
 0x206   : > { %1511 = vrcp.f32 %v656_v19 }
 0x209   : > { %v659_v20 = vpop.xlane.xlu1 %658 }
 0x20a   : > { %1513 = vrcp.f32 %v659_v20 }
 0x20d   : > { %v662_v21 = vpop.xlane.xlu0 %661 }
 0x20e   : > { %1515 = vrcp.f32 %v662_v21 }
 0x211   : > { %v665_v23 = vpop.xlane.xlu1 %664 }
 0x212   : > { %1517 = vrcp.f32 %v665_v23 }
 0x213   : > { %v1512_v25 = vpop.eup %1511 }
 0x214   : > { %v670_v27 = vmul.f32 %v1512_v25, %v1504_v5 }
 0x216   : > { %v674_v28 = vpack.c.bf16 %v670_v27, %v670_v27 }
 0x217   : > { %v1514_v31 = vpop.eup %1513 }
 0x218   : > { %1422 = vmatmul.mubr.msk.bf16.vlgmr.msra.gmra.mxu0 %vm428_vm1, %v674_v28  ;;  %v671_v32 = vmul.f32 %v1514_v31, %v1506_v7 }
 0x219   : > { %1432 = vmatpush3.bf16.msra.mxu0 %v775_v29  ;;  %1433 = vmatprep.mubr.msk.bf16.mxu0 %vm1532_vm0, %v1531_v0  ;;  %v1497_v29 = vld [vmem:[%s1747_s7 + $0x8] sm:$0xff]  }
 0x21a   : > { %v675_v33 = vpack.c.bf16 %v671_v32, %v671_v32  ;;  %1443 = vmatprep.subr.bf16.mxu0 %v1531_v0 }
 0x21b   : > { %v1516_v35 = vpop.eup %1515 }
 0x21c   : > { %1428 = vmatmul.mubr.msk.bf16.vlgmr.msra.gmra.mxu1 %vm428_vm1, %v675_v33  ;;  %v672_v37 = vmul.f32 %v1516_v35, %v1508_v9  ;;  %v1349_v35 = vld [vmem:[%s1746_s6] ss:$0 sm:$0xff] }
 0x21d   : > { %1438 = vmatpush3.bf16.msra.mxu1 %v821_v34  ;;  %1439 = vmatprep.mubr.msk.bf16.mxu1 %vm1532_vm0, %v1531_v0 }
 0x21e   : > { %v676_v38 = vpack.c.bf16 %v672_v37, %v672_v37  ;;  %1449 = vmatprep.subr.bf16.mxu1 %v1531_v0 }
 0x21f   : > { %v1518_v40 = vpop.eup %1517 }
 0x220   : > { %1434 = vmatmul.mubr.msk.bf16.vlgmr.msra.gmra.mxu0 %vm428_vm1, %v676_v38  ;;  %v673_v41 = vmul.f32 %v1518_v40, %v1510_v11  ;;  %v1500_v40 = vld [vmem:[%s1748_s8 + $0x10] sm:$0xff]  }
 0x221   : > { %1444 = vmatpush3.bf16.msra.mxu0 %v869_v39  ;;  %1445 = vmatprep.mubr.msk.bf16.mxu0 %vm1532_vm0, %v1531_v0  ;;  %v1499_v39 = vld [vmem:[%s1748_s8 + $0x18] sm:$0xff]  }
 0x222   : > { %v677_v42 = vpack.c.bf16 %v673_v41, %v673_v41  ;;  %1455 = vmatprep.subr.bf16.mxu0 %v1531_v0  ;;  %v1501_v41 = vld [vmem:[%s1748_s8 + $0x8] sm:$0xff]  }
 0x224   : > { %1440 = vmatmul.mubr.msk.bf16.vlgmr.msra.gmra.mxu1 %vm428_vm1, %v677_v42  ;;  %v1502_v42 = vld [vmem:[%s1748_s8] sm:$0xff]  }
 0x225   : > { %1451 = vmatprep.mubr.msk.bf16.mxu1 %vm1532_vm0, %v1531_v0  ;;  %1450 = vmatpush3.bf16.msra.mxu1 %v918_v44 }
 0x226   : > { %1461 = vmatprep.subr.bf16.mxu1 %v1531_v0 }
 0x2d8   : > { %v719_v46 = vpop.f32.mrf.mxu0 }
 0x2d9   : > { %v864_v47 = vpack.c.bf16 %v719_v46, %v719_v46 }
 0x2da   : > { %v1423_v49 = vpop.f32.mrf.mxu0 }
 0x2db   : > { %1446 = vmatmul.mubr.msk.bf16.vlgmr.msra.gmra.mxu0 %vm428_vm1, %v864_v47 }
 0x2dc   : > { %v722_v51 = vpop.f32.mrf.mxu0  ;;  %v765_v52 = vpop.f32.mrf.mxu1  ;;  %1456 = vmatpush3.bf16.msra.mxu0 %v967_v48  ;;  %1457 = vmatprep.mubr.msk.bf16.mxu0 %vm1532_vm0, %v1531_v0 }
 0x2dd   : > { %v913_v53 = vpack.c.bf16 %v765_v52, %v765_v52  ;;  %1467 = vmatprep.subr.bf16.mxu0 %v1531_v0 }
 0x2de   : > { %v1424_v55 = vpop.f32.mrf.mxu0  ;;  %v1429_v56 = vpop.f32.mrf.mxu1 }
 0x2df   : > { %1452 = vmatmul.mubr.msk.bf16.vlgmr.msra.gmra.mxu1 %vm428_vm1, %v913_v53 }
 0x2e0   : > { %v768_v57 = vpop.f32.mrf.mxu1  ;;  %v811_v58 = vpop.f32.mrf.mxu0  ;;  %1462 = vmatpush3.bf16.msra.mxu1 %v1016_v54  ;;  %1463 = vmatprep.mubr.msk.bf16.mxu1 %vm1532_vm0, %v1531_v0 }
 0x2e1   : > { %v962_v59 = vpack.c.bf16 %v811_v58, %v811_v58  ;;  %1475 = vmatprep.subr.bf16.mxu1 %v1531_v0 }
 0x2e2   : > { %v1430_v60 = vpop.f32.mrf.mxu1  ;;  %v1435_v61 = vpop.f32.mrf.mxu0 }
 0x2e3   : > { %1458 = vmatmul.mubr.msk.bf16.vlgmr.msra.gmra.mxu0 %vm428_vm1, %v962_v59 }
 0x2e4   : > { %v814_v62 = vpop.f32.mrf.mxu0  ;;  %v857_v63 = vpop.f32.mrf.mxu1  ;;  %1471 = vmatprep.mubr.msk.bf16.mxu0 %vm1532_vm0, %v1531_v0  ;;  %1468 = vmatpush3.bf16.msra.mxu0 %v1497_v29 }
 0x2e5   : > { %v1011_v1 = vpack.c.bf16 %v857_v63, %v857_v63  ;;  %1469 = vmatprep.subr.bf16.mxu0 %v1531_v0 }
 0x2e6   : > { %v1436_v2 = vpop.f32.mrf.mxu0  ;;  %v1441_v3 = vpop.f32.mrf.mxu1 }
 0x2e7   : > { %1464 = vmatmul.mubr.msk.bf16.vlgmr.msra.gmra.mxu1 %vm428_vm1, %v1011_v1 }
 0x2e8   : > { %v860_v4 = vpop.f32.mrf.mxu1  ;;  %1483 = vmatprep.mubr.msk.bf16.mxu1 %vm1532_vm0, %v1531_v0  ;;  %1470 = vmatpush3.bf16.msra.mxu0 %v1498_v30 }
 0x2e9   : > { %1476 = vmatpush3.bf16.msra.mxu1 %v1499_v39 }
 0x2ea   : > { %v1442_v5 = vpop.f32.mrf.mxu1  ;;  %1477 = vmatprep.subr.bf16.mxu1 %v1531_v0 }
 0x2ed   : > { %1478 = vmatpush3.bf16.msra.mxu1 %v1500_v40 }
 0x2ee   : > { %1479 = vmatprep.subr.bf16.mxu1 %v1531_v0 }
 0x2f1   : > { %1480 = vmatpush3.bf16.msra.mxu1 %v1501_v41 }
 0x2f2   : > { %1481 = vmatprep.subr.bf16.mxu1 %v1531_v0 }
 0x2f5   : > { %1482 = vmatpush3.bf16.msra.mxu1 %v1502_v42 }
 0x39b   : > { %v905_v6 = vpop.f32.mrf.mxu0 }
 0x39c   : > { %v911_v13 = vadd.f32 %v905_v6, %v403_v8 }
 0x39d   : > { %v1447_v7 = vpop.f32.mrf.mxu0 }
 0x39f   : > { %v908_v9 = vpop.f32.mrf.mxu0  ;;  %v954_v10 = vpop.f32.mrf.mxu1 }
 0x3a0   : > { %v960_v16 = vadd.f32 %v954_v10, %v911_v13 }
 0x3a1   : > { %v1448_v11 = vpop.f32.mrf.mxu0  ;;  %v1453_v12 = vpop.f32.mrf.mxu1 }
 0x3a3   : > { %v957_v14 = vpop.f32.mrf.mxu1  ;;  %v1003_v15 = vpop.f32.mrf.mxu0 }
 0x3a4   : > { %v1009_v19 = vadd.f32 %v1003_v15, %v960_v16 }
 0x3a5   : > { %v1454_v17 = vpop.f32.mrf.mxu1  ;;  %v1459_v18 = vpop.f32.mrf.mxu0 }
 0x3a7   : > { %v1006_v20 = vpop.f32.mrf.mxu0  ;;  %v1052_v21 = vpop.f32.mrf.mxu1 }
 0x3a8   : > { %v1058_v22 = vadd.f32 %v1052_v21, %v1009_v19 }
 0x3a9   : > { %v1460_v23 = vpop.f32.mrf.mxu0  ;;  %v1465_v24 = vpop.f32.mrf.mxu1 }
 0x3aa   : > { %v1059_v25 = vmul.f32 %v1058_v22, %v1058_v22 }
 0x3ab   : > { %v1055_v26 = vpop.f32.mrf.mxu1 }
 0x3ac   : > { %v1061_v27 = vsel %vm1060_vm3, %v1059_v25, 0.0 }
 0x3ad   : > { %v1466_v28 = vpop.f32.mrf.mxu1  ;;  %1062 = vadd.xlane.f32.xlu0 %v1061_v27 }
 0x436   : > { %v1063_v31 = vpop.xlane.xlu0 %1062 }
 0x437   : > { %v1065_v32 = vmul.f32 0.03125, %v1063_v31 }
 0x439   : > { %v1066_v33 = vadd.f32 1e-06, %v1065_v32 }
 0x43b   : > { %1519 = vrsqrt.f32 %v1066_v33 }
 0x448   : > { %v1520_v34 = vpop.eup %1519 }
 0x449   : > { %v1068_v36 = vmul.f32 %v1520_v34, %v1058_v22 }
 0x44b   : > { %v1076_v37 = vmul.f32 %v1349_v35, %v1068_v36 }
 0x44d   : > { %v1081_v38 = vpack.c.bf16 %v1076_v37, %v1076_v37 }
 0x44f   : > { %1472 = vmatmul.mubr.msk.bf16.vlgmr.msra.gmra.mxu0 %vm1060_vm3, %v1081_v38 }
 0x50f   : > { %v1131_v43 = vpop.f32.mrf.mxu0 }
 0x510   : > { %v1137_v44 = vmul.f32 %v1131_v43, %v1131_v43 }
 0x511   : > { %v1473_v45 = vpop.f32.mrf.mxu0 }
 0x512   : > { %v1138_v46 = vmul.f32 %v1137_v44, %v1131_v43 }
 0x513   : > { %v1134_v47 = vpop.f32.mrf.mxu0 }
 0x514   : > { %v1139_v48 = vmul.f32 0.044715, %v1138_v46 }
 0x515   : > { %v1474_v49 = vpop.f32.mrf.mxu0 }
 0x516   : > { %v1140_v50 = vadd.f32 %v1139_v48, %v1131_v43 }
 0x518   : > { %v1141_v51 = vmul.f32 0.7978846, %v1140_v50 }
 0x51a   : > { %1521 = vtanh.f32 %v1141_v51 }
 0x527   : > { %v1522_v52 = vpop.eup %1521 }
 0x528   : > { %v1143_v53 = vadd.f32 1.0, %v1522_v52 }
 0x52a   : > { %v1144_v54 = vmul.f32 0.5, %v1143_v53 }
 0x52c   : > { %v1145_v0 = vmul.f32 %v1144_v54, %v1131_v43 }
 0x52e   : > { %v1154_v55 = vpack.c.bf16 %v1145_v0, %v1145_v0 }
 0x530   : > { %1484 = vmatmul.mubr.msk.bf16.vlgmr.msra.gmra.mxu1 %vm1179_vm4, %v1154_v55 }
 0x5f0   : > { %v1217_v56 = vpop.f32.mrf.mxu1 }
 0x5f1   : > { %v1223_v57 = vadd.f32 %v1217_v56, %v1058_v22 }
 0x5f2   : > { %v1485_v58 = vpop.f32.mrf.mxu1 }
 0x5f3   : > { %1224 = vst.msk [vmem:[%s401_s15] sm:$0xff] %vm1060_vm3, %v1223_v57 }
 0x5f4   : > { %v1220_v59 = vpop.f32.mrf.mxu1 }
 0x5f6   : > { %v1486_v60 = vpop.f32.mrf.mxu1 }
 0x5f7 PF: > { %s19_s30 = sadd.s32 1, %s1529_s30  }
 0x5f8   : > { %p16_p4 = scmp.ge.s32.totalorder %s19_s30, 4  }
 0x5fa   :  { %18 = sbr.rel (!%p16_p4) target bundleno = 1 (0x1), region = 98 }

</bundles_post_ra>
